<compile_context>
chip_gen: v6e
topology: v6e:2x2x1
jax: 0.10.0
libtpu: 0.0.40
codegen_flags: <defaults>
</compile_context>

<pallas_src>
from functools import partial

import jax
import jax.numpy as jnp
from jax.experimental import pallas as pl
from jax.experimental.pallas import tpu as pltpu


def mycell_kernel(x_ref, h_ref, wt_ref, b_ref, o_ref):
    # x_ref: [TB, FP], h_ref: [TB, FP], wt_ref: [FP, FP] (already W^T),
    # b_ref: [1, FP], o_ref: [TB, FP]
    y = jnp.dot(x_ref[...], wt_ref[...], preferred_element_type=jnp.float32)
    y = y + b_ref[...] + h_ref[...].astype(jnp.float32)
    o_ref[...] = jnp.tanh(y).astype(o_ref.dtype)


@partial(jax.jit, static_argnames=())
def mycell_forward(x, h, weight, bias):
    """new_h = tanh(x @ weight.T + bias + h); returns (new_h, new_h).

    x, h: [B, F]; weight: [F_out, F_in] (PyTorch layout); bias: [F_out].
    """
    B, F_in = x.shape
    F_out = weight.shape[0]
    dt = x.dtype

    FP = 128                                     # lane-dense feature width
    TB_MAX = 512                                 # batch tile; safe vs v7x 64 MiB VMEM
    TB = min(TB_MAX, max(8, ((B + 7) // 8) * 8))
    B_pad = ((B + TB - 1) // TB) * TB            # whole number of batch tiles

    # Zero-pad to lane-dense / tile-aligned shapes.
    x_p = jnp.zeros((B_pad, FP), dt).at[:B, :F_in].set(x)
    h_p = jnp.zeros((B_pad, FP), dt).at[:B, :F_out].set(h)
    wt_p = jnp.zeros((FP, FP), dt).at[:F_in, :F_out].set(weight.T.astype(dt))
    b_p = jnp.zeros((1, FP), jnp.float32).at[0, :F_out].set(bias.astype(jnp.float32))

    grid = (B_pad // TB,)
    out = pl.pallas_call(
        mycell_kernel,
        out_shape=jax.ShapeDtypeStruct((B_pad, FP), dt),
        grid=grid,
        in_specs=[
            pl.BlockSpec((TB, FP), lambda i: (i, 0)),   # x: streamed per batch tile
            pl.BlockSpec((TB, FP), lambda i: (i, 0)),   # h: streamed per batch tile
            pl.BlockSpec((FP, FP), lambda i: (0, 0)),   # W^T: resident across tiles
            pl.BlockSpec((1, FP), lambda i: (0, 0)),    # bias: resident across tiles
        ],
        out_specs=pl.BlockSpec((TB, FP), lambda i: (i, 0)),
        compiler_params=pltpu.CompilerParams(
            dimension_semantics=("parallel",),          # v7x: split batch over 2 TCs
            vmem_limit_bytes=32 * 1024 * 1024,
        ),
    )(x_p, h_p, wt_p, b_p)

    new_h = out[:B, :F_out]
    return new_h, new_h


if __name__ == "__main__":
    key = jax.random.PRNGKey(0)
    k_x, k_h, k_w, k_b = jax.random.split(key, 4)

    B, F = 8, 4  # batch=8, features=4 (Linear(4, 4))

    x = jax.random.normal(k_x, (B, F), dtype=jnp.float32)
    h = jax.random.normal(k_h, (B, F), dtype=jnp.float32)

    # Deterministic PyTorch-style init: uniform(-1/sqrt(fan_in), 1/sqrt(fan_in))
    bound = 1.0 / jnp.sqrt(jnp.float32(F))
    weight = jax.random.uniform(k_w, (F, F), dtype=jnp.float32,
                                minval=-bound, maxval=bound)
    bias = jax.random.uniform(k_b, (F,), dtype=jnp.float32,
                              minval=-bound, maxval=bound)

    new_h, new_h2 = mycell_forward(x, h, weight, bias)
    jax.block_until_ready(new_h)

    # Reference check in plain JAX
    ref = jnp.tanh(x @ weight.T + bias + h)
    assert new_h.shape == (B, F)
    assert jnp.allclose(new_h, ref, atol=1e-5, rtol=1e-5)
    assert (new_h == new_h2).all()

    print("KERNEL_OK")
</pallas_src>

<mosaic_0001>
module attributes {stable_mosaic.version = 11 : i64} {
  func.func @mycell_kernel(%arg0: i32, %arg1: memref<8x128xf32, #tpu.memory_space<vmem>>, %arg2: memref<8x128xf32, #tpu.memory_space<vmem>>, %arg3: memref<128x128xf32, #tpu.memory_space<vmem>>, %arg4: memref<1x128xf32, #tpu.memory_space<vmem>>, %arg5: memref<8x128xf32, #tpu.memory_space<vmem>>) attributes {dimension_semantics = [#tpu.dimension_semantics<parallel>], iteration_bounds = array<i64: 1>, scalar_prefetch = 0 : i64, scratch_operands = 0 : i64, tpu.core_type = #tpu.core_type<tc>, window_params = [{transform_indices = @transform_0, window_bounds = array<i64: 8, 128>}, {transform_indices = @transform_1, window_bounds = array<i64: 8, 128>}, {pipeline_mode = #tpu.pipeline_mode<synchronous>, transform_indices = @transform_2, window_bounds = array<i64: 128, 128>}, {pipeline_mode = #tpu.pipeline_mode<synchronous>, transform_indices = @transform_3, window_bounds = array<i64: 1, 128>}, {transform_indices = @transform_4, window_bounds = array<i64: 8, 128>}]} {
    %c0 = arith.constant 0 : index
    %c0_0 = arith.constant 0 : index
    %0 = vector.load %arg1[%c0, %c0_0] : memref<8x128xf32, #tpu.memory_space<vmem>>, vector<8x128xf32>
    %c0_1 = arith.constant 0 : index
    %c0_2 = arith.constant 0 : index
    %1 = vector.load %arg3[%c0_1, %c0_2] : memref<128x128xf32, #tpu.memory_space<vmem>>, vector<128x128xf32>
    %cst = arith.constant dense<0.000000e+00> : vector<8x128xf32>
    %2 = tpu.matmul %0, %1, %cst {dimension_numbers = #tpu.dot_dimension_numbers<[1], [0], [0], [1], [0, 0, 1, 1], [], []>} : vector<8x128xf32>, vector<128x128xf32>, vector<8x128xf32> -> vector<8x128xf32>
    %c0_3 = arith.constant 0 : index
    %c0_4 = arith.constant 0 : index
    %3 = vector.load %arg4[%c0_3, %c0_4] : memref<1x128xf32, #tpu.memory_space<vmem>>, vector<1x128xf32>
    %4 = vector.broadcast %3 : vector<1x128xf32> to vector<8x128xf32>
    %5 = arith.addf %2, %4 : vector<8x128xf32>
    %c0_5 = arith.constant 0 : index
    %c0_6 = arith.constant 0 : index
    %6 = vector.load %arg2[%c0_5, %c0_6] : memref<8x128xf32, #tpu.memory_space<vmem>>, vector<8x128xf32>
    %7 = arith.addf %5, %6 : vector<8x128xf32>
    %8 = math.tanh %7 : vector<8x128xf32>
    %c0_7 = arith.constant 0 : index
    %c0_8 = arith.constant 0 : index
    %9 = vector.load %arg5[%c0_7, %c0_8] : memref<8x128xf32, #tpu.memory_space<vmem>>, vector<8x128xf32>
    tpu.vector_store %arg5[%c0_7, %c0_8], %8 {strides = array<i32>} : memref<8x128xf32, #tpu.memory_space<vmem>>, vector<8x128xf32>,
    return
  }
  func.func @transform_0(%arg0: i32) -> (i32, i32) {
    %c0_i32 = arith.constant 0 : i32
    %c0_i32_0 = arith.constant 0 : i32
    return %arg0, %c0_i32 : i32, i32
  }
  func.func @transform_1(%arg0: i32) -> (i32, i32) {
    %c0_i32 = arith.constant 0 : i32
    %c0_i32_0 = arith.constant 0 : i32
    return %arg0, %c0_i32 : i32, i32
  }
  func.func @transform_2(%arg0: i32) -> (i32, i32) {
    %c0_i32 = arith.constant 0 : i32
    %c0_i32_0 = arith.constant 0 : i32
    %c0_i32_1 = arith.constant 0 : i32
    return %c0_i32, %c0_i32_0 : i32, i32
  }
  func.func @transform_3(%arg0: i32) -> (i32, i32) {
    %c0_i32 = arith.constant 0 : i32
    %c0_i32_0 = arith.constant 0 : i32
    %c0_i32_1 = arith.constant 0 : i32
    return %c0_i32, %c0_i32_0 : i32, i32
  }
  func.func @transform_4(%arg0: i32) -> (i32, i32) {
    %c0_i32 = arith.constant 0 : i32
    %c0_i32_0 = arith.constant 0 : i32
    return %arg0, %c0_i32 : i32, i32
  }
}

</mosaic_0001>

<bundles_post_ra>
// kernel: mycell_forward.1
= control target key start
LH: loop header
LB: loop body
LE: loop exit
PB: predicated region body
PF: predicated region fallthrough
CT: control target
= control target key end

     0   :  { %v176_v0 = vmov 0.0   ;;  %vm177_vm0 = vmmov 0   ;;  %s263_s2 = inlined_call_operand.vmem [shape: f32[128,128], index: 2, kind: input, shape index: {}]   ;;  %s264_s0 = inlined_call_operand.vmem [shape: f32[8,128], index: 0, kind: input, shape index: {}]   ;;  %s265_s3 = inlined_call_operand.vmem [shape: f32[1,128], index: 3, kind: input, shape index: {}]   ;;  %s266_s1 = inlined_call_operand.vmem [shape: f32[8,128], index: 1, kind: input, shape index: {}]   ;;  %s267_s4 = inlined_call_operand.vmem [shape: f32[8,128], index: 4, kind: output, shape index: {}]  }
   0x1   :  { %137 = vmatprep.subr.mxu0 %v176_v0  ;;  %v33_v1 = vld [vmem:[%s263_s2 + $0x78] sm:$0xff]  ;;  %v32_v2 = vld [vmem:[%s263_s2 + $0x70] sm:$0xff]  ;;  %169 = vmatprep.mubr.msk.f32.mxu0 %vm177_vm0, %v176_v0  ;;  %v31_v3 = vld [vmem:[%s263_s2 + $0x68] sm:$0xff] }
   0x2   :  { %138 = vmatpush3.msra.mxu0 %v33_v1  ;;  %v30_v4 = vld [vmem:[%s263_s2 + $0x60] sm:$0xff]  ;;  %v29_v5 = vld [vmem:[%s263_s2 + $0x58] sm:$0xff]  ;;  %v28_v6 = vld [vmem:[%s263_s2 + $0x50] sm:$0xff] }
   0x3   :  { %139 = vmatprep.subr.mxu0 %v176_v0  ;;  %v27_v7 = vld [vmem:[%s263_s2 + $0x48] sm:$0xff]  ;;  %v26_v8 = vld [vmem:[%s263_s2 + $0x40] sm:$0xff]  ;;  %v25_v9 = vld [vmem:[%s263_s2 + $0x38] sm:$0xff] }
   0x4   :  { %140 = vmatpush3.msra.mxu0 %v32_v2  ;;  %v24_v10 = vld [vmem:[%s263_s2 + $0x30] sm:$0xff]  ;;  %v23_v11 = vld [vmem:[%s263_s2 + $0x28] sm:$0xff]  ;;  %v22_v12 = vld [vmem:[%s263_s2 + $0x20] sm:$0xff] }
   0x5   :  { %141 = vmatprep.subr.mxu0 %v176_v0  ;;  %v21_v13 = vld [vmem:[%s263_s2 + $0x18] sm:$0xff]  ;;  %v20_v14 = vld [vmem:[%s263_s2 + $0x10] sm:$0xff]  ;;  %v19_v15 = vld [vmem:[%s263_s2 + $0x8] sm:$0xff] }
   0x6   :  { %142 = vmatpush3.msra.mxu0 %v31_v3  ;;  %v18_v16 = vld [vmem:[%s263_s2] sm:$0xff] }
   0x7   :  { %143 = vmatprep.subr.mxu0 %v176_v0  ;;  %v17_v17 = vld [vmem:[%s264_s0] sm:$0xff] }
   0x8   :  { %144 = vmatpush3.msra.mxu0 %v30_v4  ;;  %v119_v18 = vld [vmem:[%s265_s3] ss:$0 sm:$0xff] }
   0x9   :  { %145 = vmatprep.subr.mxu0 %v176_v0  ;;  %v111_v20 = vld [vmem:[%s266_s1] sm:$0xff] }
   0xa   :  { %146 = vmatpush3.msra.mxu0 %v29_v5 }
   0xb   :  { %147 = vmatprep.subr.mxu0 %v176_v0 }
   0xc   :  { %148 = vmatpush3.msra.mxu0 %v28_v6 }
   0xd   :  { %149 = vmatprep.subr.mxu0 %v176_v0 }
   0xe   :  { %150 = vmatpush3.msra.mxu0 %v27_v7 }
   0xf   :  { %151 = vmatprep.subr.mxu0 %v176_v0 }
  0x10   :  { %152 = vmatpush3.msra.mxu0 %v26_v8 }
  0x11   :  { %153 = vmatprep.subr.mxu0 %v176_v0 }
  0x12   :  { %154 = vmatpush3.msra.mxu0 %v25_v9 }
  0x13   :  { %155 = vmatprep.subr.mxu0 %v176_v0 }
  0x14   :  { %156 = vmatpush3.msra.mxu0 %v24_v10 }
  0x15   :  { %157 = vmatprep.subr.mxu0 %v176_v0 }
  0x16   :  { %158 = vmatpush3.msra.mxu0 %v23_v11 }
  0x17   :  { %159 = vmatprep.subr.mxu0 %v176_v0 }
  0x18   :  { %160 = vmatpush3.msra.mxu0 %v22_v12 }
  0x19   :  { %161 = vmatprep.subr.mxu0 %v176_v0 }
  0x1a   :  { %162 = vmatpush3.msra.mxu0 %v21_v13 }
  0x1b   :  { %163 = vmatprep.subr.mxu0 %v176_v0 }
  0x1c   :  { %164 = vmatpush3.msra.mxu0 %v20_v14 }
  0x1d   :  { %165 = vmatprep.subr.mxu0 %v176_v0 }
  0x1e   :  { %166 = vmatpush3.msra.mxu0 %v19_v15 }
  0x1f   :  { %167 = vmatprep.subr.mxu0 %v176_v0 }
  0x20   :  { %168 = vmatpush3.msra.mxu0 %v18_v16 }
  0x21   :  { %170 = vmatmul.mubr.f32.vlgmr.msra.gmra.mxu0 %v17_v17 }
  0xe1   :  { %v107_v19 = vpop.f32.mrf.mxu0 }
  0xe2   :  { %v108_v21 = vadd.f32 %v119_v18, %v107_v19 }
  0xe3   :  { %v171_v22 = vpop.f32.mrf.mxu0 }
  0xe4   :  { %v112_v23 = vadd.f32 %v111_v20, %v108_v21 }
  0xe6   :  { %174 = vtanh.f32 %v112_v23 }
  0xf3   :  { %v175_v24 = vpop.eup %174 }
  0xf4   :  { %114 = vst [vmem:[%s267_s4] sm:$0xff] %v175_v24 }

</bundles_post_ra>
